<compile_context>
chip_gen: v7x
topology: tpu7x:2x2x1
jax: 0.10.0
libtpu: 0.0.40
codegen_flags: <defaults>
</compile_context>

<pallas_src>
import jax
import jax.numpy as jnp
from jax.experimental import pallas as pl
from jax.experimental.pallas import tpu as pltpu


def _ffn_ln_kernel(x_ref, w1_ref, b1_ref, w2_ref, b2_ref, g_ref, beta_ref,
                   o_ref, acc_ref, xb_ref):
    """One (row-tile, d_ff-chunk) grid step of LayerNorm(x + fc2(relu(fc1(x))))."""
    k = pl.program_id(1)

    @pl.when(k == 0)
    def _():
        # Init the accumulator with the broadcast fc2 bias (saves an epilogue
        # add) and hoist the f32 -> bf16 cast of the x tile (done once per row
        # tile instead of once per d_ff chunk).
        acc_ref[...] = jnp.broadcast_to(b2_ref[...], acc_ref.shape)
        xb_ref[...] = x_ref[...].astype(xb_ref.dtype)

    # fc1 chunk + ReLU: bf16 MXU inputs, f32 accumulation.
    h = jnp.dot(xb_ref[...], w1_ref[...], preferred_element_type=jnp.float32)
    h = jnp.maximum(h + b1_ref[...], 0.0)

    # TODO(synk): dropout layers are identity in eval mode; training-mode
    # stochastic dropout (pltpu.prng_*) is not implemented here.

    # fc2 partial product over this d_ff chunk, accumulated in f32 VMEM.
    acc_ref[...] += jnp.dot(h.astype(w2_ref.dtype), w2_ref[...],
                            preferred_element_type=jnp.float32)

    @pl.when(k == pl.num_programs(1) - 1)
    def _():
        r = x_ref[...].astype(jnp.float32) + acc_ref[...]   # residual in f32
        inv_d = 1.0 / r.shape[-1]
        mean = jnp.sum(r, axis=-1, keepdims=True) * inv_d
        meansq = jnp.sum(r * r, axis=-1, keepdims=True) * inv_d
        var = jnp.maximum(meansq - mean * mean, 0.0)
        normed = (r - mean) * jax.lax.rsqrt(var + 1e-5)      # eps = nn.LayerNorm default
        o_ref[...] = (normed * g_ref[...] + beta_ref[...]).astype(o_ref.dtype)


def _round_up(x, m):
    return (x + m - 1) // m * m


def _vmem_capacity_bytes():
    """Physical per-core VMEM (64 MiB on v7x, 128 MiB on v5e/v6e)."""
    try:
        return int(pltpu.get_tpu_info().vmem_capacity_bytes)
    except Exception:
        return 64 << 20  # conservative (v7x) fallback


def _default_row_tile():
    """Generation-dependent row tile: past the compute/memory knee everywhere."""
    try:
        kind = jax.devices()[0].device_kind.lower()
    except Exception:
        kind = ""
    if "v6" in kind:
        return 1024
    return 512  # v5e / v7x / unknown


def _pick_ff_tile(d_ff, max_tile):
    """Return (tk_ff, padded_d_ff).

    Prefers 256-aligned tiles dividing d_ff (v6e/v7x 2x256x256 MXU), then
    128-aligned (v5e); otherwise zero-pads d_ff so weights are never fully
    resident.
    """
    if d_ff <= max_tile:
        return d_ff, d_ff
    for align in (256, 128):
        t = max_tile - (max_tile % align)
        while t >= align:
            if d_ff % t == 0:
                return t, d_ff
            t -= align
    t = max(256, max_tile - (max_tile % 256))
    return t, _round_up(d_ff, t)


def position_wise_feed_forward(x, w1, b1, w2, b2, gamma, beta, *,
                               row_tile=None, tk_ff_max=512,
                               matmul_dtype=jnp.bfloat16):
    """out = LayerNorm(x + fc2(relu(fc1(x)))).  x: (B, S, d_model)."""
    B, S, d_model = x.shape
    d_ff = w1.shape[1]
    rows = B * S

    vmem_cap = _vmem_capacity_bytes()
    budget = (vmem_cap * 3) // 4          # working-set target (headroom for compiler)
    cap = max((vmem_cap * 7) // 8, 32 << 20)

    if row_tile is None:
        row_tile = _default_row_tile()

    # --- row tile (padded to a multiple of 8; padded rows sliced off after) ---
    tm_eff = min(row_tile, _round_up(rows, 8))
    rows_p = _round_up(rows, tm_eff)
    # Guarantee >= 2 steps on the "parallel" row axis so v7x can split it
    # across both TensorCores (megacore) whenever there is enough work.
    if rows > 8 and rows_p // tm_eff < 2:
        tm_eff = max(8, _round_up((rows + 1) // 2, 8))
        rows_p = _round_up(rows, tm_eff)

    # --- d_ff reduction tile (zero-pad d_ff when it has no suitable divisor) ---
    tk_ff, d_ff_p = _pick_ff_tile(d_ff, tk_ff_max)

    w_sz = jnp.dtype(matmul_dtype).itemsize
    x_sz = x.dtype.itemsize

    def est(tm, tk):
        return (2 * tm * d_model * x_sz           # x tiles (double-buffered)
                + 2 * tm * d_model * x_sz         # out tiles
                + 2 * d_model * tk * w_sz         # W1 chunks
                + 2 * tk * d_model * w_sz         # W2 chunks
                + 2 * (tk + 3 * d_model) * 4      # biases / LN params
                + tm * d_model * 4                # f32 accumulator scratch
                + tm * d_model * w_sz             # bf16 x scratch
                + tm * tk * 4)                    # hidden slab

    # Shrink row tile first, then the d_ff tile, until within the VMEM budget.
    while est(tm_eff, tk_ff) > budget and tm_eff > 256:
        tm_eff = max(256, tm_eff // 2)
        rows_p = _round_up(rows, tm_eff)
    while est(tm_eff, tk_ff) > budget and tk_ff > 256:
        new_tk, new_dffp = _pick_ff_tile(d_ff, tk_ff // 2)
        if new_tk >= tk_ff:
            break
        tk_ff, d_ff_p = new_tk, new_dffp

    # --- operand prep: bf16 matmul weights, f32 biases / LN params ---
    x2 = x.reshape(rows, d_model)
    if rows_p != rows:
        x2 = jnp.pad(x2, ((0, rows_p - rows), (0, 0)))

    w1c = w1.astype(matmul_dtype)
    w2c = w2.astype(matmul_dtype)
    b1r = b1.reshape(1, d_ff).astype(jnp.float32)
    if d_ff_p != d_ff:
        w1c = jnp.pad(w1c, ((0, 0), (0, d_ff_p - d_ff)))
        w2c = jnp.pad(w2c, ((0, d_ff_p - d_ff), (0, 0)))
        b1r = jnp.pad(b1r, ((0, 0), (0, d_ff_p - d_ff)))
    b2r = b2.reshape(1, d_model).astype(jnp.float32)
    gr = gamma.reshape(1, d_model).astype(jnp.float32)
    br = beta.reshape(1, d_model).astype(jnp.float32)

    # Always set the scoped-VMEM limit (v5e default is only 16 MiB), clamped
    # to the real device capacity (never above ~7/8 of physical VMEM).
    est_bytes = est(tm_eff, tk_ff)
    vmem_limit = int(min(max(int(est_bytes * 1.5), 32 << 20), cap))

    n_row_tiles = rows_p // tm_eff
    cost = pl.CostEstimate(
        flops=4 * rows_p * d_model * d_ff_p,
        transcendentals=rows_p,
        bytes_accessed=(x2.size * x_sz                       # x in
                        + rows_p * d_model * x_sz            # out
                        + n_row_tiles * (w1c.size + w2c.size) * w_sz),  # weights re-streamed per row tile
    )

    out = pl.pallas_call(
        _ffn_ln_kernel,
        out_shape=jax.ShapeDtypeStruct((rows_p, d_model), x.dtype),
        grid_spec=pltpu.PrefetchScalarGridSpec(
            num_scalar_prefetch=0,
            grid=(n_row_tiles, d_ff_p // tk_ff),
            in_specs=[
                pl.BlockSpec((tm_eff, d_model), lambda i, k: (i, 0)),   # x rows
                pl.BlockSpec((d_model, tk_ff), lambda i, k: (0, k)),    # W1 chunk
                pl.BlockSpec((1, tk_ff), lambda i, k: (0, k)),          # b1 chunk
                pl.BlockSpec((tk_ff, d_model), lambda i, k: (k, 0)),    # W2 chunk
                pl.BlockSpec((1, d_model), lambda i, k: (0, 0)),        # b2
                pl.BlockSpec((1, d_model), lambda i, k: (0, 0)),        # gamma
                pl.BlockSpec((1, d_model), lambda i, k: (0, 0)),        # beta
            ],
            out_specs=pl.BlockSpec((tm_eff, d_model), lambda i, k: (i, 0)),
            scratch_shapes=[pltpu.VMEM((tm_eff, d_model), jnp.float32),   # f32 acc
                            pltpu.VMEM((tm_eff, d_model), matmul_dtype)], # bf16 x
        ),
        compiler_params=pltpu.CompilerParams(
            dimension_semantics=("parallel", "arbitrary"),
            vmem_limit_bytes=vmem_limit,
        ),
        cost_estimate=cost,
    )(x2, w1c, b1r, w2c, b2r, gr, br)

    if rows_p != rows:
        out = out[:rows]
    return out.reshape(B, S, d_model)


def _reference(x, w1, b1, w2, b2, gamma, beta):
    h = jnp.maximum(x @ w1 + b1, 0.0)
    y = h @ w2 + b2
    r = x + y
    mean = jnp.mean(r, axis=-1, keepdims=True)
    var = jnp.var(r, axis=-1, keepdims=True)
    return (r - mean) / jnp.sqrt(var + 1e-5) * gamma + beta


if __name__ == "__main__":
    # Small shapes consistent with the module's forward.
    B, S, d_model, d_ff = 2, 8, 32, 128

    key = jax.random.PRNGKey(0)
    kx, k1, k2, k3, k4 = jax.random.split(key, 5)

    x = jax.random.normal(kx, (B, S, d_model), dtype=jnp.float32)

    # Deterministic synthetic parameters (fc1: d_model->d_ff, fc2: d_ff->d_model)
    w1 = jax.random.normal(k1, (d_model, d_ff), dtype=jnp.float32) * (1.0 / d_model ** 0.5)
    b1 = jax.random.normal(k2, (d_ff,), dtype=jnp.float32) * 0.01
    w2 = jax.random.normal(k3, (d_ff, d_model), dtype=jnp.float32) * (1.0 / d_ff ** 0.5)
    b2 = jax.random.normal(k4, (d_model,), dtype=jnp.float32) * 0.01
    gamma = jnp.ones((d_model,), dtype=jnp.float32)
    beta = jnp.zeros((d_model,), dtype=jnp.float32)

    out = position_wise_feed_forward(x, w1, b1, w2, b2, gamma, beta)
    out = jax.block_until_ready(out)
    ref = _reference(x, w1, b1, w2, b2, gamma, beta)
    assert out.shape == (B, S, d_model)
    # bf16 matmul inputs with f32 accumulation -> relaxed tolerance vs f32 ref.
    assert jnp.allclose(out, ref, atol=2e-2, rtol=2e-2), "mismatch vs reference"

    # Also exercise the row-padding path (rows not a multiple of the tile).
    x_odd = jax.random.normal(kx, (2, 7, d_model), dtype=jnp.float32)
    out_odd = jax.block_until_ready(
        position_wise_feed_forward(x_odd, w1, b1, w2, b2, gamma, beta))
    ref_odd = _reference(x_odd, w1, b1, w2, b2, gamma, beta)
    assert out_odd.shape == (2, 7, d_model)
    assert jnp.allclose(out_odd, ref_odd, atol=2e-2, rtol=2e-2), "mismatch (padded path)"

    print("KERNEL_OK")
</pallas_src>

<mosaic_0001>
module attributes {stable_mosaic.version = 11 : i64} {
  func.func @_ffn_ln_kernel(%arg0: i32, %arg1: i32, %arg2: memref<8x32xf32, #tpu.memory_space<vmem>>, %arg3: memref<32x128xbf16, #tpu.memory_space<vmem>>, %arg4: memref<1x128xf32, #tpu.memory_space<vmem>>, %arg5: memref<128x32xbf16, #tpu.memory_space<vmem>>, %arg6: memref<1x32xf32, #tpu.memory_space<vmem>>, %arg7: memref<1x32xf32, #tpu.memory_space<vmem>>, %arg8: memref<1x32xf32, #tpu.memory_space<vmem>>, %arg9: memref<8x32xf32, #tpu.memory_space<vmem>>, %arg10: memref<8x32xf32, #tpu.memory_space<vmem>>, %arg11: memref<8x32xbf16, #tpu.memory_space<vmem>>) attributes {dimension_semantics = [#tpu.dimension_semantics<parallel>, #tpu.dimension_semantics<arbitrary>], iteration_bounds = array<i64: 2, 1>, scalar_prefetch = 0 : i64, scratch_operands = 2 : i64, tpu.core_type = #tpu.core_type<tc>, window_params = [{transform_indices = @transform_0, window_bounds = array<i64: 8, 32>}, {transform_indices = @transform_1, window_bounds = array<i64: 32, 128>}, {transform_indices = @transform_2, window_bounds = array<i64: 1, 128>}, {transform_indices = @transform_3, window_bounds = array<i64: 128, 32>}, {pipeline_mode = #tpu.pipeline_mode<synchronous>, transform_indices = @transform_4, window_bounds = array<i64: 1, 32>}, {pipeline_mode = #tpu.pipeline_mode<synchronous>, transform_indices = @transform_5, window_bounds = array<i64: 1, 32>}, {pipeline_mode = #tpu.pipeline_mode<synchronous>, transform_indices = @transform_6, window_bounds = array<i64: 1, 32>}, {transform_indices = @transform_7, window_bounds = array<i64: 8, 32>}]} {
    %c0_i32 = arith.constant 0 : i32
    %0 = arith.cmpi eq, %arg1, %c0_i32 : i32
    %1 = arith.extui %0 : i1 to i32
    %c0_i32_0 = arith.constant 0 : i32
    %2 = arith.cmpi ne, %1, %c0_i32_0 : i32
    scf.if %2 {
      %c0_16 = arith.constant 0 : index
      %c0_17 = arith.constant 0 : index
      %20 = vector.load %arg6[%c0_16, %c0_17] : memref<1x32xf32, #tpu.memory_space<vmem>>, vector<1x32xf32>
      %21 = vector.shape_cast %20 : vector<1x32xf32> to vector<1x32xf32>
      %22 = vector.broadcast %21 : vector<1x32xf32> to vector<8x32xf32>
      %c0_18 = arith.constant 0 : index
      %c0_19 = arith.constant 0 : index
      %23 = vector.load %arg10[%c0_18, %c0_19] : memref<8x32xf32, #tpu.memory_space<vmem>>, vector<8x32xf32>
      tpu.vector_store %arg10[%c0_18, %c0_19], %22 {strides = array<i32>} : memref<8x32xf32, #tpu.memory_space<vmem>>, vector<8x32xf32>,
      %c0_20 = arith.constant 0 : index
      %c0_21 = arith.constant 0 : index
      %24 = vector.load %arg2[%c0_20, %c0_21] : memref<8x32xf32, #tpu.memory_space<vmem>>, vector<8x32xf32>
      %25 = arith.truncf %24 : vector<8x32xf32> to vector<8x32xbf16>
      %c0_22 = arith.constant 0 : index
      %c0_23 = arith.constant 0 : index
      %26 = vector.load %arg11[%c0_22, %c0_23] : memref<8x32xbf16, #tpu.memory_space<vmem>>, vector<8x32xbf16>
      tpu.vector_store %arg11[%c0_22, %c0_23], %25 {strides = array<i32>} : memref<8x32xbf16, #tpu.memory_space<vmem>>, vector<8x32xbf16>,
    } else {
    }
    %c0 = arith.constant 0 : index
    %c0_1 = arith.constant 0 : index
    %3 = vector.load %arg11[%c0, %c0_1] : memref<8x32xbf16, #tpu.memory_space<vmem>>, vector<8x32xbf16>
    %c0_2 = arith.constant 0 : index
    %c0_3 = arith.constant 0 : index
    %4 = vector.load %arg3[%c0_2, %c0_3] : memref<32x128xbf16, #tpu.memory_space<vmem>>, vector<32x128xbf16>
    %cst = arith.constant dense<0.000000e+00> : vector<8x128xf32>
    %5 = tpu.matmul %3, %4, %cst {dimension_numbers = #tpu.dot_dimension_numbers<[1], [0], [0], [1], [0, 0, 1, 1], [], []>} : vector<8x32xbf16>, vector<32x128xbf16>, vector<8x128xf32> -> vector<8x128xf32>
    %c0_4 = arith.constant 0 : index
    %c0_5 = arith.constant 0 : index
    %6 = vector.load %arg4[%c0_4, %c0_5] : memref<1x128xf32, #tpu.memory_space<vmem>>, vector<1x128xf32>
    %7 = vector.broadcast %6 : vector<1x128xf32> to vector<8x128xf32>
    %8 = arith.addf %5, %7 : vector<8x128xf32>
    %cst_6 = arith.constant 0.000000e+00 : f32
    %9 = vector.broadcast %cst_6 : f32 to vector<8x128xf32>
    %10 = arith.maximumf %8, %9 : vector<8x128xf32>
    %c0_7 = arith.constant 0 : index
    %c0_8 = arith.constant 0 : index
    %11 = vector.load %arg10[%c0_7, %c0_8] : memref<8x32xf32, #tpu.memory_space<vmem>>, vector<8x32xf32>
    %12 = arith.truncf %10 : vector<8x128xf32> to vector<8x128xbf16>
    %c0_9 = arith.constant 0 : index
    %c0_10 = arith.constant 0 : index
    %13 = vector.load %arg5[%c0_9, %c0_10] : memref<128x32xbf16, #tpu.memory_space<vmem>>, vector<128x32xbf16>
    %cst_11 = arith.constant dense<0.000000e+00> : vector<8x32xf32>
    %14 = tpu.matmul %12, %13, %cst_11 {dimension_numbers = #tpu.dot_dimension_numbers<[1], [0], [0], [1], [0, 0, 1, 1], [], []>} : vector<8x128xbf16>, vector<128x32xbf16>, vector<8x32xf32> -> vector<8x32xf32>
    %15 = arith.addf %11, %14 : vector<8x32xf32>
    %c0_12 = arith.constant 0 : index
    %c0_13 = arith.constant 0 : index
    %16 = vector.load %arg10[%c0_12, %c0_13] : memref<8x32xf32, #tpu.memory_space<vmem>>, vector<8x32xf32>
    tpu.vector_store %arg10[%c0_12, %c0_13], %15 {strides = array<i32>} : memref<8x32xf32, #tpu.memory_space<vmem>>, vector<8x32xf32>,
    %c0_i32_14 = arith.constant 0 : i32
    %17 = arith.cmpi eq, %arg1, %c0_i32_14 : i32
    %18 = arith.extui %17 : i1 to i32
    %c0_i32_15 = arith.constant 0 : i32
    %19 = arith.cmpi ne, %18, %c0_i32_15 : i32
    scf.if %19 {
      %c0_16 = arith.constant 0 : index
      %c0_17 = arith.constant 0 : index
      %20 = vector.load %arg2[%c0_16, %c0_17] : memref<8x32xf32, #tpu.memory_space<vmem>>, vector<8x32xf32>
      %c0_18 = arith.constant 0 : index
      %c0_19 = arith.constant 0 : index
      %21 = vector.load %arg10[%c0_18, %c0_19] : memref<8x32xf32, #tpu.memory_space<vmem>>, vector<8x32xf32>
      %22 = arith.addf %20, %21 : vector<8x32xf32>
      %cst_20 = arith.constant dense<0.000000e+00> : vector<8xf32>
      %23 = vector.multi_reduction <add>, %22, %cst_20 [1] : vector<8x32xf32> to vector<8xf32>
      %24 = vector.shape_cast %23 : vector<8xf32> to vector<8x1xf32>
      %cst_21 = arith.constant 3.125000e-02 : f32
      %25 = vector.broadcast %cst_21 : f32 to vector<8x1xf32>
      %26 = arith.mulf %24, %25 : vector<8x1xf32>
      %27 = arith.mulf %22, %22 : vector<8x32xf32>
      %cst_22 = arith.constant dense<0.000000e+00> : vector<8xf32>
      %28 = vector.multi_reduction <add>, %27, %cst_22 [1] : vector<8x32xf32> to vector<8xf32>
      %29 = vector.shape_cast %28 : vector<8xf32> to vector<8x1xf32>
      %cst_23 = arith.constant 3.125000e-02 : f32
      %30 = vector.broadcast %cst_23 : f32 to vector<8x1xf32>
      %31 = arith.mulf %29, %30 : vector<8x1xf32>
      %32 = arith.mulf %26, %26 : vector<8x1xf32>
      %33 = arith.subf %31, %32 : vector<8x1xf32>
      %cst_24 = arith.constant 0.000000e+00 : f32
      %34 = vector.broadcast %cst_24 : f32 to vector<8x1xf32>
      %35 = arith.maximumf %33, %34 : vector<8x1xf32>
      %36 = vector.broadcast %26 : vector<8x1xf32> to vector<8x32xf32>
      %37 = arith.subf %22, %36 : vector<8x32xf32>
      %cst_25 = arith.constant 9.99999974E-6 : f32
      %38 = vector.broadcast %cst_25 : f32 to vector<8x1xf32>
      %39 = arith.addf %35, %38 : vector<8x1xf32>
      %40 = math.rsqrt %39 : vector<8x1xf32>
      %41 = vector.broadcast %40 : vector<8x1xf32> to vector<8x32xf32>
      %42 = arith.mulf %37, %41 : vector<8x32xf32>
      %c0_26 = arith.constant 0 : index
      %c0_27 = arith.constant 0 : index
      %43 = vector.load %arg7[%c0_26, %c0_27] : memref<1x32xf32, #tpu.memory_space<vmem>>, vector<1x32xf32>
      %44 = vector.broadcast %43 : vector<1x32xf32> to vector<8x32xf32>
      %45 = arith.mulf %42, %44 : vector<8x32xf32>
      %c0_28 = arith.constant 0 : index
      %c0_29 = arith.constant 0 : index
      %46 = vector.load %arg8[%c0_28, %c0_29] : memref<1x32xf32, #tpu.memory_space<vmem>>, vector<1x32xf32>
      %47 = vector.broadcast %46 : vector<1x32xf32> to vector<8x32xf32>
      %48 = arith.addf %45, %47 : vector<8x32xf32>
      %c0_30 = arith.constant 0 : index
      %c0_31 = arith.constant 0 : index
      %49 = vector.load %arg9[%c0_30, %c0_31] : memref<8x32xf32, #tpu.memory_space<vmem>>, vector<8x32xf32>
      tpu.vector_store %arg9[%c0_30, %c0_31], %48 {strides = array<i32>} : memref<8x32xf32, #tpu.memory_space<vmem>>, vector<8x32xf32>,
    } else {
    }
    return
  }
  func.func @transform_0(%arg0: i32, %arg1: i32) -> (i32, i32) {
    %c0_i32 = arith.constant 0 : i32
    %c0_i32_0 = arith.constant 0 : i32
    return %arg0, %c0_i32 : i32, i32
  }
  func.func @transform_1(%arg0: i32, %arg1: i32) -> (i32, i32) {
    %c0_i32 = arith.constant 0 : i32
    %c0_i32_0 = arith.constant 0 : i32
    return %c0_i32, %arg1 : i32, i32
  }
  func.func @transform_2(%arg0: i32, %arg1: i32) -> (i32, i32) {
    %c0_i32 = arith.constant 0 : i32
    %c0_i32_0 = arith.constant 0 : i32
    return %c0_i32, %arg1 : i32, i32
  }
  func.func @transform_3(%arg0: i32, %arg1: i32) -> (i32, i32) {
    %c0_i32 = arith.constant 0 : i32
    %c0_i32_0 = arith.constant 0 : i32
    return %arg1, %c0_i32 : i32, i32
  }
  func.func @transform_4(%arg0: i32, %arg1: i32) -> (i32, i32) {
    %c0_i32 = arith.constant 0 : i32
    %c0_i32_0 = arith.constant 0 : i32
    %c0_i32_1 = arith.constant 0 : i32
    return %c0_i32, %c0_i32_0 : i32, i32
  }
  func.func @transform_5(%arg0: i32, %arg1: i32) -> (i32, i32) {
    %c0_i32 = arith.constant 0 : i32
    %c0_i32_0 = arith.constant 0 : i32
    %c0_i32_1 = arith.constant 0 : i32
    return %c0_i32, %c0_i32_0 : i32, i32
  }
  func.func @transform_6(%arg0: i32, %arg1: i32) -> (i32, i32) {
    %c0_i32 = arith.constant 0 : i32
    %c0_i32_0 = arith.constant 0 : i32
    %c0_i32_1 = arith.constant 0 : i32
    return %c0_i32, %c0_i32_0 : i32, i32
  }
  func.func @transform_7(%arg0: i32, %arg1: i32) -> (i32, i32) {
    %c0_i32 = arith.constant 0 : i32
    %c0_i32_0 = arith.constant 0 : i32
    return %arg0, %c0_i32 : i32, i32
  }
}

</mosaic_0001>

<bundles_post_ra>
// kernel: tpu_custom_call.1
= control target key start
LH: loop header
LB: loop body
LE: loop exit
PB: predicated region body
PF: predicated region fallthrough
CT: control target
= control target key end

     0   :  { %12 = vsyncpa [#allocation5], 0  ;;  %s1117_s0 = inlined_call_operand.vmem [shape: f32[16,32], index: 0, kind: input, shape index: {}]   ;;  %s1118_s1 = inlined_call_operand.vmem [shape: bf16[32,128], index: 1, kind: input, shape index: {}]   ;;  %s1119_s2 = inlined_call_operand.vmem [shape: f32[1,128], index: 2, kind: input, shape index: {}]   ;;  %s1120_s3 = inlined_call_operand.vmem [shape: bf16[128,32], index: 3, kind: input, shape index: {}]   ;;  %s1121_s4 = inlined_call_operand.vmem [shape: f32[1,32], index: 4, kind: input, shape index: {}]   ;;  %s1122_s5 = inlined_call_operand.vmem [shape: f32[1,32], index: 5, kind: input, shape index: {}]   ;;  %s1123_s6 = inlined_call_operand.vmem [shape: f32[1,32], index: 6, kind: input, shape index: {}]   ;;  %s1124_s7 = inlined_call_operand.hbm [shape: f32[16,32], index: 7, kind: output, shape index: {}]  }
   0x1   :  { %14 = vsyncpa [#allocation5 + $0x1], 0  ;;  %s957_s24 = smov 0   ;;  %s959_s25 = smov 0  }
   0x2   :  { %s961_s26 = smov 0   ;;  %s963_s27 = smov 0  }
   0x3   :  { %s965_s28 = smov 0   ;;  %s967_s29 = smov 0  }
   0x4 LB: > { %s696_s30 = sadd.s32 4294967295, %s912_s29   ;;  %s697_s8 = sadd.s32 4294967294, %s912_s29   ;;  %s912_s29 = sphi %s967_s29, %s20_s29   ;;  %s908_s28 = sphi %s965_s28, %s1131_s28   ;;  %s904_s27 = sphi %s963_s27, %s1130_s27   ;;  %s900_s26 = sphi %s961_s26, %s1129_s26   ;;  %s896_s25 = sphi %s959_s25, %s1128_s25   ;;  %s892_s24 = sphi %s957_s24, %s1127_s24  }
   0x5   : > { %s32_s9 = sadd.s32 1, %s908_s28  ;;  %s206_s10 = sadd.s32 1, %s900_s26 }
   0x6   : > { %p34_p0 = scmp.ge.s32.totalorder %s32_s9, 2  ;;  %p216_p1 = scmp.ne.s32.totalorder %s900_s26, %s896_s25 }
   0x7   : > { %p217_p2 = scmp.eq.s32.totalorder %s696_s30, 1  ;;  %p222_p3 = scmp.ne.s32.totalorder %s896_s25, %s892_s24 }
   0x8   : > { %s1133_s9 = smov (%p34_p0, %s32_s9), 0  ;;  %p223_p5 = scmp.eq.s32.totalorder %s697_s8, 1 }
   0x9   : > { %p997_p4 = por %p217_p2, %p216_p1  ;;  %s203_s12 = ssub.s32 %s908_s28, %s1133_s9 }
   0xa   : > { %p703_p6 = scmp.ge.s32.totalorder %s912_s29, 1  ;;  %p204_p7 = scmp.eq.s32.totalorder %s203_s12, 0 }
   0xb   : > { %p1004_p8 = por %p223_p5, %p222_p3  ;;  %p279_p9 = scmp.lt.s32.totalorder %s912_s29, 3 }
   0xc   : > { %s1010_s14 = scalar_select %p204_p7, %s900_s26, %s206_s10  }
   0xd   : > { %p280_p10 = pnand %p703_p6, %p279_p9 }
   0xe   : > { %v822_v0 = vld [vmem:[%s1118_s1] sm:$0xff] (!%p280_p10)   ;;  %v914_v1 = vmov (!%p280_p10), 0.0   ;;  %v823_v2 = vld [vmem:[%s1118_s1 + $0x8] sm:$0xff] (!%p280_p10)   ;;  %vm915_vm0 = vmmov (!%p280_p10), 0   ;;  %p322_p11 = scmp.lt.s32.totalorder (!%p280_p10), %s904_s27, 1  ;;  %vm355_vm1 = vcmask (!%p280_p10), 257024  }
   0xf   : > { %283 = sbr.rel (%p280_p10) target bundleno = 665 (0x299), region = 48  ;;  %737 = vmatprep.subr.bf16.mxu0 (!%p280_p10), %v914_v1  ;;  %745 = vmatprep.subr.bf16.mxu1 (!%p280_p10), %v914_v1  ;;  %v824_v3 = vld [vmem:[%s1120_s3] sm:$0xff] (!%p280_p10)   ;;  %v825_v4 = vld [vmem:[%s1120_s3 + $0x8] sm:$0xff] (!%p280_p10)   ;;  %v826_v6 = vld [vmem:[%s1120_s3 + $0x10] sm:$0xff] (!%p280_p10)   ;;  %vm351_vm2 = vcmask (!%p280_p10), 261120   ;;  %s319_s18 = sand.u32 (!%p280_p10), 1, %s896_s25  }
  0x10   : > { %738 = vmatpush3.bf16.msra.mxu0 (!%p280_p10), %v822_v0  ;;  %741 = vmatprep.mubr.msk.bf16.mxu0 (!%p280_p10), %vm915_vm0, %v914_v1  ;;  %v827_v8 = vld [vmem:[%s1120_s3 + $0x18] sm:$0xff] (!%p280_p10)   ;;  %v828_v9 = vld [vmem:[%s1120_s3 + $0x20] sm:$0xff] (!%p280_p10)   ;;  %v829_v11 = vld [vmem:[%s1120_s3 + $0x28] sm:$0xff] (!%p280_p10)   ;;  %s704_s19 = sshll.u32 (!%p280_p10), %s319_s18, 3  ;;  %s574_s17 = scalar_lea.sflag (!%p280_p10), [#allocation5], %s319_s18 }
  0x11   : > { %739 = vmatprep.subr.bf16.mxu0 (!%p280_p10), %v914_v1  ;;  %761 = vmatprep.mubr.msk.bf16.mxu1 (!%p280_p10), %vm915_vm0, %v914_v1  ;;  %v830_v12 = vld [vmem:[%s1120_s3 + $0x30] sm:$0xff] (!%p280_p10)   ;;  %v831_v13 = vld [vmem:[%s1120_s3 + $0x38] sm:$0xff] (!%p280_p10)   ;;  %v706_v14 = vld [vmem:[%s1121_s4] ss:$0 sm:$0xff] (!%p280_p10)  ;;  %s321_s8 = scalar_lea.vmem (!%p280_p10), [#allocation4], %s704_s19 }
  0x12   : > { %746 = vmatpush3.bf16.msra.mxu1 (!%p280_p10), %v824_v3  ;;  %352 = vst.msk [vmem:[#allocation2] sm:$0xff] (!%p280_p10), %vm351_vm2, %v706_v14  ;;  %v707_v15 = vld [vmem:[%s1119_s2] ss:$0 sm:$0xff] (!%p280_p10)  ;;  %s587_s10 = sshll.u32 (!%p280_p10), %s321_s8, 4  ;;  %s1071_s10 = int_to_ptr.vmem [resolvable:$true] %s587_s10 }
  0x13   : > { %747 = vmatprep.subr.bf16.mxu1 (!%p280_p10), %v914_v1  ;;  %v719_v44 = vld [vmem:[%s1122_s5] ss:$0 sm:$0xff] (!%p280_p10)  ;;  %s834_s20 = scalar_lea.vmem (!%p280_p10), %s1071_s10, 128 }
  0x14   : > { %740 = vmatpush3.bf16.msra.mxu0 (!%p280_p10), %v823_v2  ;;  %v720_v46 = vld [vmem:[%s1123_s6] ss:$0 sm:$0xff] (!%p280_p10)  ;;  %p835_p12 = scmp.ne.s32.totalorder (!%p280_p10), %s1071_s10, %s834_s20 }
  0x16   : > { %s323_s21 = scalar_select %p322_p11, %s904_s27, 1  ;;  %748 = vmatpush3.bf16.msra.mxu1 %v825_v4 }
  0x17   : > { %749 = vmatprep.subr.bf16.mxu1 %v914_v1  ;;  %p836_p13 = pnand %p835_p12, %p997_p4 }
  0x18   : > { %s705_s30 = sshll.u32 %s323_s21, 3 }
  0x19   : > { %s325_s12 = scalar_lea.vmem %s1117_s0, %s705_s30  ;;  %v426_v23 = vld [vmem:[#allocation2] sm:$0xff]  ;;  %s722_s30 = sshll.u32 %s904_s27, 7 }
  0x1a   : > { %v353_v5 = vld [vmem:[%s325_s12] sm:$0xff]  ;;  %750 = vmatpush3.bf16.msra.mxu1 %v826_v6  ;;  %s1069_s16 = scalar_lea.hbm %s1124_s7, %s722_s30  ;;  %p837_p0 = pneg %p836_p13 }
  0x1b   : > { %v354_v7 = vpack.c.bf16 %v353_v5, %v353_v5  ;;  %751 = vmatprep.subr.bf16.mxu1 %v914_v1  ;;  %s916_s27 = smov [#allocation4]  }
  0x1c   : > { %s838_s19 = sshll.u32 %s916_s27, 4  ;;  %s839_s19 = int_to_ptr.vmem [resolvable:$false] %s838_s19 }
  0x1d   : > { %356 = vst.msk [vmem:[#allocation3] sm:$0xf] %vm355_vm1, %v354_v7  ;;  %s840_s21 = scalar_lea.vmem %s839_s19, 256  ;;  %p841_p1 = scmp.lt.s32.totalorder %s1071_s10, %s839_s19 }
  0x1e   : > { %752 = vmatpush3.bf16.msra.mxu1 %v827_v8  ;;  %p842_p2 = scmp.lt.s32.totalorder %s840_s21, %s834_s20 }
  0x1f   : > { %753 = vmatprep.subr.bf16.mxu1 %v914_v1 }
  0x20   : > { %p843_p3 = por %p842_p2, %p841_p1 }
  0x22   : > { %754 = vmatpush3.bf16.msra.mxu1 %v828_v9  ;;  %p844_p5 = pnand %p843_p3, %p837_p0 }
  0x23   : > { %755 = vmatprep.subr.bf16.mxu1 %v914_v1 }
  0x24   : > { %v357_v10 = vld [vmem:[#allocation3] sm:$0xf] }
  0x25   : > { %742 = vmatmul.mubr.msk.bf16.vlgmr.msra.gmra.mrb[0].mxu0 %vm351_vm2, %v357_v10 }
  0x26   : > { %756 = vmatpush3.bf16.msra.mxu1 %v829_v11 }
  0x27   : > { %757 = vmatprep.subr.bf16.mxu1 %v914_v1 }
  0x2a   : > { %758 = vmatpush3.bf16.msra.mxu1 %v830_v12 }
  0x2b   : > { %759 = vmatprep.subr.bf16.mxu1 %v914_v1 }
  0x2e   : > { %760 = vmatpush3.bf16.msra.mxu1 %v831_v13 }
  0xf8   : > { %v419_v16 = vpop.f32.mrb[0].mxu0 }
  0xf9   : > { %v420_v17 = vadd.f32 %v707_v15, %v419_v16  ;;  %v743_v18 = vpop.f32.mrb[1].mxu0 }
  0xfa   : > { %v422_v19 = vpop.f32.mrb[2].mxu0 }
  0xfb   : > { %v425_v20 = vmax.f32 %v420_v17, 0.0  ;;  %v744_v21 = vpop.f32.mrb[3].mxu0 }
  0xfd   : > { %v427_v22 = vpack.c.bf16 %v425_v20, %v425_v20 }
  0xff   : > { %762 = vmatmul.mubr.bf16.vlgmr.msra.gmra.mrb[0].mxu1 %v427_v22 }
 0x1d2   : > { %v526_v24 = vpop.f32.mrb[0].mxu1 }
 0x1d3   : > { %v532_v25 = vadd.f32 %v526_v24, %v426_v23  ;;  %v763_v26 = vpop.f32.mrb[1].mxu1 }
 0x1d4   : > { %v529_v27 = vpop.f32.mrb[2].mxu1 }
 0x1d5   : > { %533 = vst.msk [vmem:[#allocation2] sm:$0xff] %vm351_vm2, %v532_v25  ;;  %v764_v28 = vpop.f32.mrb[3].mxu1 }
 0x1dc   : > { %v538_v29 = vld [vmem:[#allocation2] sm:$0xff] }
 0x1dd   : > { %v539_v30 = vadd.f32 %v538_v29, %v353_v5 }
 0x1df   : > { %v540_v31 = vsel %vm351_vm2, %v539_v30, 0.0  ;;  %v544_v32 = vmul.f32 %v539_v30, %v539_v30 }
 0x1e0   : > { %541 = vadd.xlane.f32.xlu0 %v540_v31 }
 0x1e1   : > { %v545_v33 = vsel %vm351_vm2, %v544_v32, 0.0 }
 0x1e4   : > { %546 = vadd.xlane.f32.xlu0 %v545_v33 }
 0x26d   : > { %v542_v34 = vpop.xlane.xlu0 %541 }
 0x26e   : > { %v543_v35 = vmul.f32 0.03125, %v542_v34 }
 0x270   : > { %v549_v37 = vmul.f32 %v543_v35, %v543_v35  ;;  %v552_v42 = vsub.f32 %v539_v30, %v543_v35 }
 0x271   : > { %v547_v36 = vpop.xlane.xlu0 %546 }
 0x272   : > { %v548_v38 = vmul.f32 0.03125, %v547_v36 }
 0x274   : > { %v550_v39 = vsub.f32 %v548_v38, %v549_v37 }
 0x276   : > { %v551_v40 = vmax.f32 %v550_v39, 0.0 }
 0x278   : > { %v553_v41 = vadd.f32 1e-05, %v551_v40 }
 0x27a   : > { %832 = vrsqrt.f32 %v553_v41 }
 0x284   : > { %v833_v43 = vpop.eup %832 }
 0x285   : > { %v555_v45 = vmul.f32 %v833_v43, %v552_v42 }
 0x287   : > { %v563_v47 = vmul.f32 %v719_v44, %v555_v45 }
 0x289   : > { %v571_v48 = vadd.f32 %v720_v46, %v563_v47 }
 0x28b   : > { %572 = vst.msk [vmem:[%s321_s8] sm:$0xff] %vm351_vm2, %v571_v48 }
 0x28c   : > { %847 = shalt.err (!%p844_p5)
}
 0x28d   : > { %s848_s18 = scalar_lea.hbm %s1069_s16, 128  ;;  %s852_s30 = scalar_lea.hbm %s1124_s7, 256 }
 0x28e   : > { %p849_p6 = scmp.ne.s32.totalorder %s1069_s16, %s848_s18  ;;  %p853_p10 = scmp.lt.u32.totalorder %s1069_s16, %s1124_s7 }
 0x28f   : > { %p854_p11 = scmp.lt.u32.totalorder %s852_s30, %s848_s18  ;;  %p856_p13 = scmp.lt.u32.totalorder %s848_s18, %s1069_s16 }
 0x290   : > { %p850_p7 = pnand %p849_p6, %p997_p4 }
 0x291   : > { %p855_p12 = por %p854_p11, %p853_p10 }
 0x292   : > { %p851_p9 = pneg %p850_p7 }
 0x293   : > { %p857_p0 = por %p856_p13, %p855_p12 }
 0x295   : > { %p858_p1 = pnand %p857_p0, %p851_p9 }
 0x297   : > { %861 = shalt.err (!%p858_p1)
}
 0x298   : > { %765 = dma.vmem_to_hbm [thread:$0]  (%p997_p4), %s1071_s10, 128, %s1069_s16, %s574_s17  }
 0x299 PF: > { %p771_p2 = scmp.ge.s32.totalorder %s912_s29, 2  ;;  %s599_s15 = sand.u32 1, %s892_s24  }
 0x29a   : > { %s600_s20 = scalar_lea.sflag [#allocation5], %s599_s15 }
 0x29b   : > { %p768_p3 = pnand %p771_p2, %p1004_p8 }
 0x29d   : > { %887 = dma.done.wait (!%p768_p3), %s600_s20, 128  }
 0x29e   : > { %889 = vsyncadd (!%p768_p3), %s600_s20, 4294967168  ;;  %s20_s29 = sadd.s32 1, %s912_s29   ;;  %s1127_s24 = smov %s896_s25 }
 0x29f   : > { %p17_p5 = scmp.ge.s32.totalorder %s20_s29, 4   ;;  %s1128_s25 = smov %s900_s26 }
 0x2a0   : > { %s1129_s26 = smov %s1010_s14  ;;  %s1130_s27 = smov %s908_s28 }
 0x2a1   : > { %s1131_s28 = smov %s1133_s9  ;;  %19 = sbr.rel (!%p17_p5) target bundleno = 4 (0x4), region = 100 }
 0x2a8   :  { %605 = vsyncpa [#allocation5], 1 }
 0x2a9   :  { %607 = vsyncpa [#allocation5 + $0x1], 1 }

</bundles_post_ra>
